<compile_context>
chip_gen: v5e
topology: v5e:2x2
jax: 0.10.0
libtpu: 0.0.40
codegen_flags: <defaults>
</compile_context>

<pallas_src>
import math

import jax
import jax.numpy as jnp
from jax.experimental import pallas as pl
from jax.experimental.pallas import tpu as pltpu


def _round_up(x, m):
    return ((x + m - 1) // m) * m


# ----------------------------------------------------------------------------
# Kernel
# ----------------------------------------------------------------------------
def _make_mlp_kernel(num_hidden, nonlin="relu"):
    """Fused MLP kernel with feature-major activations.

    Ref order: xT_ref, (w0, b0, ..., w_{H-1}, b_{H-1}, w_out, b_out), o_ref
      xT_ref : [in_dim, bb]        bf16   (batch on lanes)
      w_i    : [out_i, in_i]       bf16   (PyTorch nn.Linear layout)
      b_i    : [out_i, 1]          f32
      w_out  : [hidden_last, 1]    f32
      b_out  : [1, 1]              f32
      o_ref  : [1, bb]             f32    (lane-dense logits row)
    """

    def kernel(*refs):
        xT_ref = refs[0]
        o_ref = refs[-1]
        p = refs[1:-1]

        h = xT_ref[...]                                        # [in, bb] bf16
        for i in range(num_hidden):
            w = p[2 * i][...]                                  # bf16 [out_i, in_i]
            b = p[2 * i + 1][...]                              # f32  [out_i, 1]
            acc = jnp.dot(w, h.astype(jnp.bfloat16),           # MXU, f32 accumulate
                          preferred_element_type=jnp.float32)
            z = acc + b                                        # f32 VPU (lane broadcast)
            if nonlin == "relu":
                h = jnp.maximum(z, 0.0)                        # f32 ReLU
            else:
                h = jax.nn.sigmoid(z)                          # EUP

        # Head (hidden -> 1): VPU multiply + sublane (XLU) reduction.  Avoids an
        # N=1 MXU matmul and yields a lane-dense [1, bb] row -> unmasked store.
        w_out = p[-2][...]                                     # f32 [hidden_last, 1]
        b_out = p[-1][...]                                     # f32 [1, 1]
        logits = jnp.sum(h.astype(jnp.float32) * w_out,
                         axis=0, keepdims=True) + b_out        # [1, bb] f32
        o_ref[...] = logits.astype(o_ref.dtype)

    return kernel


# ----------------------------------------------------------------------------
# Wrapper
# ----------------------------------------------------------------------------
def binary_classifier_forward(x, weights, biases, *, block_batch=256, nonlin="relu"):
    """Forward pass of BinaryClassifier (returns logits, shape [B, 1]).

    x:       [B, input_size] f32
    weights: list of [out_i, in_i] f32 (PyTorch nn.Linear layout; last is [1, hidden_last])
    biases:  list of [out_i]    f32 (last is [1])
    """
    B, in_dim = x.shape
    num_layers = len(weights)
    num_hidden = num_layers - 1

    # ---- batch tile: MXU/lane aligned; keep >= 2 grid steps when the batch
    # allows (v7x has 2 TensorCores; a length-1 grid serializes onto one). ----
    block_batch = max(128, _round_up(block_batch, 128))
    if B >= 2 * block_batch:
        bb = block_batch
    elif B > 128:
        bb = min(block_batch, _round_up((B + 1) // 2, 128))
    else:
        bb = _round_up(B, 8)            # tiny batch: single tile, minimal padding
    B_pad = _round_up(B, bb)
    n_tiles = B_pad // bb

    # ---- operand prep (wrapper-side layout plumbing, not compute):
    # feature-major input so batch maps to lanes; bf16 matmul operands. ----
    xT = x.T.astype(jnp.bfloat16)                              # [in_dim, B]
    if B_pad != B:
        xT = jnp.pad(xT, ((0, 0), (0, B_pad - B)))

    flat = [xT]
    in_specs = [pl.BlockSpec((in_dim, bb), lambda i: (0, i))]
    for li in range(num_hidden):
        w = weights[li].astype(jnp.bfloat16)                   # [out_i, in_i]
        b = biases[li].reshape(-1, 1).astype(jnp.float32)      # [out_i, 1]
        flat += [w, b]
        in_specs += [pl.BlockSpec(w.shape, lambda i: (0, 0)),
                     pl.BlockSpec(b.shape, lambda i: (0, 0))]
    w_out = weights[-1].reshape(-1, 1).astype(jnp.float32)     # [hidden_last, 1]
    b_out = biases[-1].reshape(1, 1).astype(jnp.float32)       # [1, 1]
    flat += [w_out, b_out]
    in_specs += [pl.BlockSpec(w_out.shape, lambda i: (0, 0)),
                 pl.BlockSpec(b_out.shape, lambda i: (0, 0))]

    out_specs = pl.BlockSpec((1, bb), lambda i: (0, i))        # lane-dense logits row

    # ---- explicit VMEM budget (v7x: 64 MiB/TC, 32 MiB scoped default). ----
    param_bytes = sum(int(a.size) * a.dtype.itemsize for a in flat[1:])
    widest = max([in_dim] + [int(w.shape[0]) for w in weights])
    est = (2 * in_dim * bb * 2            # x tile, bf16, double-buffered
           + 2 * param_bytes              # params (conservatively x2 buffers)
           + 2 * bb * 4                   # out tile, f32, double-buffered
           + 4 * widest * bb * 4)         # live activation headroom
    vmem_limit = int(min(max(4 * est, 32 * 1024 * 1024), 48 * 1024 * 1024))

    out = pl.pallas_call(
        _make_mlp_kernel(num_hidden, nonlin=nonlin),
        out_shape=jax.ShapeDtypeStruct((1, B_pad), jnp.float32),
        grid=(n_tiles,),
        in_specs=in_specs,
        out_specs=out_specs,
        compiler_params=pltpu.CompilerParams(
            dimension_semantics=("parallel",),
            vmem_limit_bytes=vmem_limit),
    )(*flat)

    return out[0, :B].reshape(B, 1)


# ----------------------------------------------------------------------------
# Deterministic parameter init (mirrors the PyTorch __init__ semantics),
# weights kept in PyTorch [out, in] layout.
# ----------------------------------------------------------------------------
def init_params(key, input_size, hidden_sizes, nonlin="relu"):
    layer_sizes = [input_size, *hidden_sizes]
    gain = math.sqrt(2.0) if nonlin == "relu" else 1.0      # calculate_gain
    sigmoid_gain = 1.0                                      # calculate_gain('sigmoid')

    weights, biases = [], []
    for in_size, out_size in zip(layer_sizes, layer_sizes[1:]):
        key, kw, kb = jax.random.split(key, 3)
        bound_w = gain * math.sqrt(6.0 / (in_size + out_size))
        w = jax.random.uniform(kw, (out_size, in_size), jnp.float32,
                               minval=-bound_w, maxval=bound_w)
        bound_b = 1.0 / math.sqrt(in_size)
        b = jax.random.uniform(kb, (out_size,), jnp.float32,
                               minval=-bound_b, maxval=bound_b)
        weights.append(w)
        biases.append(b)

    last = layer_sizes[-1]
    key, kw, kb = jax.random.split(key, 3)
    bound_w = sigmoid_gain * math.sqrt(6.0 / (last + 1))
    w_out = jax.random.uniform(kw, (1, last), jnp.float32,
                               minval=-bound_w, maxval=bound_w)
    bound_b = 1.0 / math.sqrt(last)
    b_out = jax.random.uniform(kb, (1,), jnp.float32,
                               minval=-bound_b, maxval=bound_b)
    weights.append(w_out)
    biases.append(b_out)
    return weights, biases


def reference_forward(x, weights, biases, *, match_kernel_precision=True):
    """Pure-JAX reference with the kernel's precision policy (bf16 matmul
    operands for hidden layers, f32 accumulation, f32 head)."""
    h = x
    n = len(weights)
    for i, (w, b) in enumerate(zip(weights, biases)):
        if match_kernel_precision and i < n - 1:
            y = jnp.dot(h.astype(jnp.bfloat16), w.T.astype(jnp.bfloat16),
                        preferred_element_type=jnp.float32)
        else:
            y = jnp.dot(h.astype(jnp.float32), w.T.astype(jnp.float32),
                        preferred_element_type=jnp.float32)
        h = y + b
        if i < n - 1:
            h = jnp.maximum(h, 0.0)
    return h


# ----------------------------------------------------------------------------
if __name__ == "__main__":
    key = jax.random.PRNGKey(0)

    input_size = 32
    hidden_sizes = [64, 32]

    key, kp = jax.random.split(key)
    weights, biases = init_params(kp, input_size, hidden_sizes, nonlin="relu")

    # batch=512 exercises the optimized path (256-row MXU-aligned tiles,
    # 2-step "parallel" grid for v7x megacore); batch=10 exercises padding.
    for batch in (512, 10):
        key, kx = jax.random.split(key)
        x = jax.random.normal(kx, (batch, input_size), dtype=jnp.float32)

        out = jax.block_until_ready(
            binary_classifier_forward(x, weights, biases, block_batch=256))
        ref = reference_forward(x, weights, biases)

        assert out.shape == (batch, 1), out.shape
        assert jnp.allclose(out, ref, atol=1e-3, rtol=1e-3), (
            f"batch={batch}: max abs err "
            f"{float(jnp.max(jnp.abs(out - ref)))}")

    print("KERNEL_OK")
</pallas_src>

<mosaic_0001>
module attributes {stable_mosaic.version = 11 : i64} {
  func.func @kernel(%arg0: i32, %arg1: memref<32x256xbf16, #tpu.memory_space<vmem>>, %arg2: memref<64x32xbf16, #tpu.memory_space<vmem>>, %arg3: memref<64x1xf32, #tpu.memory_space<vmem>>, %arg4: memref<32x64xbf16, #tpu.memory_space<vmem>>, %arg5: memref<32x1xf32, #tpu.memory_space<vmem>>, %arg6: memref<32x1xf32, #tpu.memory_space<vmem>>, %arg7: memref<1x1xf32, #tpu.memory_space<vmem>>, %arg8: memref<1x256xf32, #tpu.memory_space<vmem>>) attributes {dimension_semantics = [#tpu.dimension_semantics<parallel>], iteration_bounds = array<i64: 2>, scalar_prefetch = 0 : i64, scratch_operands = 0 : i64, tpu.core_type = #tpu.core_type<tc>, window_params = [{transform_indices = @transform_0, window_bounds = array<i64: 32, 256>}, {pipeline_mode = #tpu.pipeline_mode<synchronous>, transform_indices = @transform_1, window_bounds = array<i64: 64, 32>}, {pipeline_mode = #tpu.pipeline_mode<synchronous>, transform_indices = @transform_2, window_bounds = array<i64: 64, 1>}, {pipeline_mode = #tpu.pipeline_mode<synchronous>, transform_indices = @transform_3, window_bounds = array<i64: 32, 64>}, {pipeline_mode = #tpu.pipeline_mode<synchronous>, transform_indices = @transform_4, window_bounds = array<i64: 32, 1>}, {pipeline_mode = #tpu.pipeline_mode<synchronous>, transform_indices = @transform_5, window_bounds = array<i64: 32, 1>}, {pipeline_mode = #tpu.pipeline_mode<synchronous>, transform_indices = @transform_6, window_bounds = array<i64: 1, 1>}, {transform_indices = @transform_7, window_bounds = array<i64: 1, 256>}]} {
    %c0 = arith.constant 0 : index
    %c0_0 = arith.constant 0 : index
    %0 = vector.load %arg1[%c0, %c0_0] : memref<32x256xbf16, #tpu.memory_space<vmem>>, vector<32x256xbf16>
    %c0_1 = arith.constant 0 : index
    %c0_2 = arith.constant 0 : index
    %1 = vector.load %arg2[%c0_1, %c0_2] : memref<64x32xbf16, #tpu.memory_space<vmem>>, vector<64x32xbf16>
    %c0_3 = arith.constant 0 : index
    %c0_4 = arith.constant 0 : index
    %2 = vector.load %arg3[%c0_3, %c0_4] : memref<64x1xf32, #tpu.memory_space<vmem>>, vector<64x1xf32>
    %cst = arith.constant dense<0.000000e+00> : vector<64x256xf32>
    %3 = tpu.matmul %1, %0, %cst {dimension_numbers = #tpu.dot_dimension_numbers<[1], [0], [0], [1], [0, 0, 1, 1], [], []>} : vector<64x32xbf16>, vector<32x256xbf16>, vector<64x256xf32> -> vector<64x256xf32>
    %4 = vector.broadcast %2 : vector<64x1xf32> to vector<64x256xf32>
    %5 = arith.addf %3, %4 : vector<64x256xf32>
    %cst_5 = arith.constant 0.000000e+00 : f32
    %6 = vector.broadcast %cst_5 : f32 to vector<64x256xf32>
    %7 = arith.maximumf %5, %6 : vector<64x256xf32>
    %c0_6 = arith.constant 0 : index
    %c0_7 = arith.constant 0 : index
    %8 = vector.load %arg4[%c0_6, %c0_7] : memref<32x64xbf16, #tpu.memory_space<vmem>>, vector<32x64xbf16>
    %c0_8 = arith.constant 0 : index
    %c0_9 = arith.constant 0 : index
    %9 = vector.load %arg5[%c0_8, %c0_9] : memref<32x1xf32, #tpu.memory_space<vmem>>, vector<32x1xf32>
    %10 = arith.truncf %7 : vector<64x256xf32> to vector<64x256xbf16>
    %cst_10 = arith.constant dense<0.000000e+00> : vector<32x256xf32>
    %11 = tpu.matmul %8, %10, %cst_10 {dimension_numbers = #tpu.dot_dimension_numbers<[1], [0], [0], [1], [0, 0, 1, 1], [], []>} : vector<32x64xbf16>, vector<64x256xbf16>, vector<32x256xf32> -> vector<32x256xf32>
    %12 = vector.broadcast %9 : vector<32x1xf32> to vector<32x256xf32>
    %13 = arith.addf %11, %12 : vector<32x256xf32>
    %cst_11 = arith.constant 0.000000e+00 : f32
    %14 = vector.broadcast %cst_11 : f32 to vector<32x256xf32>
    %15 = arith.maximumf %13, %14 : vector<32x256xf32>
    %c0_12 = arith.constant 0 : index
    %c0_13 = arith.constant 0 : index
    %16 = vector.load %arg6[%c0_12, %c0_13] : memref<32x1xf32, #tpu.memory_space<vmem>>, vector<32x1xf32>
    %c0_14 = arith.constant 0 : index
    %c0_15 = arith.constant 0 : index
    %17 = vector.load %arg7[%c0_14, %c0_15] : memref<1x1xf32, #tpu.memory_space<vmem>>, vector<1x1xf32>
    %18 = vector.broadcast %16 : vector<32x1xf32> to vector<32x256xf32>
    %19 = arith.mulf %15, %18 : vector<32x256xf32>
    %cst_16 = arith.constant dense<0.000000e+00> : vector<256xf32>
    %20 = vector.multi_reduction <add>, %19, %cst_16 [0] : vector<32x256xf32> to vector<256xf32>
    %21 = vector.shape_cast %20 : vector<256xf32> to vector<1x256xf32>
    %22 = vector.broadcast %17 : vector<1x1xf32> to vector<1x256xf32>
    %23 = arith.addf %21, %22 : vector<1x256xf32>
    %c0_17 = arith.constant 0 : index
    %c0_18 = arith.constant 0 : index
    %24 = vector.load %arg8[%c0_17, %c0_18] : memref<1x256xf32, #tpu.memory_space<vmem>>, vector<1x256xf32>
    tpu.vector_store %arg8[%c0_17, %c0_18], %23 {strides = array<i32>} : memref<1x256xf32, #tpu.memory_space<vmem>>, vector<1x256xf32>,
    return
  }
  func.func @transform_0(%arg0: i32) -> (i32, i32) {
    %c0_i32 = arith.constant 0 : i32
    %c0_i32_0 = arith.constant 0 : i32
    return %c0_i32, %arg0 : i32, i32
  }
  func.func @transform_1(%arg0: i32) -> (i32, i32) {
    %c0_i32 = arith.constant 0 : i32
    %c0_i32_0 = arith.constant 0 : i32
    %c0_i32_1 = arith.constant 0 : i32
    return %c0_i32, %c0_i32_0 : i32, i32
  }
  func.func @transform_2(%arg0: i32) -> (i32, i32) {
    %c0_i32 = arith.constant 0 : i32
    %c0_i32_0 = arith.constant 0 : i32
    %c0_i32_1 = arith.constant 0 : i32
    return %c0_i32, %c0_i32_0 : i32, i32
  }
  func.func @transform_3(%arg0: i32) -> (i32, i32) {
    %c0_i32 = arith.constant 0 : i32
    %c0_i32_0 = arith.constant 0 : i32
    %c0_i32_1 = arith.constant 0 : i32
    return %c0_i32, %c0_i32_0 : i32, i32
  }
  func.func @transform_4(%arg0: i32) -> (i32, i32) {
    %c0_i32 = arith.constant 0 : i32
    %c0_i32_0 = arith.constant 0 : i32
    %c0_i32_1 = arith.constant 0 : i32
    return %c0_i32, %c0_i32_0 : i32, i32
  }
  func.func @transform_5(%arg0: i32) -> (i32, i32) {
    %c0_i32 = arith.constant 0 : i32
    %c0_i32_0 = arith.constant 0 : i32
    %c0_i32_1 = arith.constant 0 : i32
    return %c0_i32, %c0_i32_0 : i32, i32
  }
  func.func @transform_6(%arg0: i32) -> (i32, i32) {
    %c0_i32 = arith.constant 0 : i32
    %c0_i32_0 = arith.constant 0 : i32
    %c0_i32_1 = arith.constant 0 : i32
    return %c0_i32, %c0_i32_0 : i32, i32
  }
  func.func @transform_7(%arg0: i32) -> (i32, i32) {
    %c0_i32 = arith.constant 0 : i32
    %c0_i32_0 = arith.constant 0 : i32
    return %c0_i32, %arg0 : i32, i32
  }
}

</mosaic_0001>

<bundles_post_ra>
// kernel: tpu_custom_call.1
= control target key start
LH: loop header
LB: loop body
LE: loop exit
PB: predicated region body
PF: predicated region fallthrough
CT: control target
= control target key end

     0   :  { %s1163_s0 = inlined_call_operand.vmem [shape: bf16[32,512], index: 0, kind: input, shape index: {}]   ;;  %s1164_s1 = inlined_call_operand.vmem [shape: bf16[64,32], index: 1, kind: input, shape index: {}]   ;;  %s1165_s2 = inlined_call_operand.vmem [shape: f32[64,1], index: 2, kind: input, shape index: {}]   ;;  %s1166_s3 = inlined_call_operand.vmem [shape: bf16[32,64], index: 3, kind: input, shape index: {}]   ;;  %s1167_s4 = inlined_call_operand.vmem [shape: f32[32,1], index: 4, kind: input, shape index: {}]   ;;  %s1168_s5 = inlined_call_operand.vmem [shape: f32[32,1], index: 5, kind: input, shape index: {}]   ;;  %s1169_s6 = inlined_call_operand.<no memory space> [shape: f32[1,1], index: 6, kind: input, shape index: {}]   ;;  %s1170_s7 = inlined_call_operand.hbm [shape: f32[1,512], index: 7, kind: output, shape index: {}]  }
   0x1   :  { %v12_v0 = vstv %s1169_s6 }
   0x2   :  { %13 = vst [vmem:[#allocation2] sm:$0x1] %v12_v0 }
   0x3   :  { %14 = vsyncpa [#allocation5], 0 }
   0x4   :  { %16 = vsyncpa [#allocation5 + $0x1], 0  ;;  %s994_s26 = smov 0   ;;  %s996_s27 = smov 0  }
   0x5   :  { %s998_s28 = smov 0   ;;  %s1000_s29 = smov 0  }
   0x6 LB: > { %s766_s6 = sadd.s32 4294967295, %s948_s29   ;;  %s767_s30 = sadd.s32 4294967294, %s948_s29   ;;  %s948_s29 = sphi %s1000_s29, %s1176_s29   ;;  %s944_s28 = sphi %s998_s28, %s1175_s28   ;;  %s940_s27 = sphi %s996_s27, %s1174_s27   ;;  %s936_s26 = sphi %s994_s26, %s1173_s26  }
   0x7   : > { %s1017_s8 = sadd.s32 1, %s948_s29   ;;  %s29_s9 = sadd.s32 1, %s944_s28 }
   0x8   : > { %s26_s10 = ssub.s32 %s948_s29, %s1017_s8  ;;  %p36_p0 = scmp.ne.s32.totalorder %s944_s28, %s940_s27 }
   0x9   : > { %p27_p1 = scmp.eq.s32.totalorder %s26_s10, 0  ;;  %p37_p2 = scmp.eq.s32.totalorder %s948_s29, 0 }
   0xa   : > { %p192_p3 = scmp.eq.s32.totalorder %s766_s6, 1  ;;  %p197_p4 = scmp.ne.s32.totalorder %s940_s27, %s936_s26 }
   0xb   : > { %s1030_s11 = scalar_select %p27_p1, %s944_s28, %s29_s9  }
   0xc   : > { %p38_p5 = por %p37_p2, %p36_p0  ;;  %p1032_p6 = por %p192_p3, %p36_p0 }
   0xd   : > { %p198_p7 = scmp.eq.s32.totalorder %s767_s30, 1  ;;  %p769_p9 = scmp.ge.s32.totalorder %s948_s29, 2 }
   0xf   : > { %p1036_p8 = por %p198_p7, %p197_p4  ;;  %232 = sbr.rel (%p769_p9) target bundleno = 28 (0x1c), region = 40 }
  0x14   : > { %235 = sbr.rel (!%p38_p5) target bundleno = 28 (0x1c), region = 44  ;;  %s237_s14 = sand.u32 (%p38_p5), 1, %s944_s28  }
  0x15   : > { %s832_s15 = sshll.u32 (%p38_p5), %s948_s29, 3  ;;  %s770_s16 = sshll.u32 (%p38_p5), %s237_s14, 5 }
  0x16   : > { %s242_s19 = scalar_lea.vmem (%p38_p5), %s1163_s0, %s832_s15  ;;  %s239_s20 = scalar_lea.vmem (%p38_p5), [#allocation3], %s770_s16 }
  0x17   : > { %v277_v1 = vld [vmem:[%s242_s19] sm:$0xff] (%p38_p5)  ;;  %v279_v2 = vld [vmem:[%s242_s19 + $0x10] sm:$0xff] (%p38_p5) }
  0x18   : > { %v281_v3 = vld [vmem:[%s242_s19 + $0x20] sm:$0xff] (%p38_p5)  ;;  %278 = vst [vmem:[%s239_s20] sm:$0xff] (%p38_p5), %v277_v1  ;;  %v283_v4 = vld [vmem:[%s242_s19 + $0x30] sm:$0xff] (%p38_p5) }
  0x19   : > { %280 = vst [vmem:[%s239_s20 + $0x8] sm:$0xff] %v279_v2 }
  0x1a   : > { %282 = vst [vmem:[%s239_s20 + $0x10] sm:$0xff] %v281_v3 }
  0x1b   : > { %284 = vst [vmem:[%s239_s20 + $0x18] sm:$0xff] %v283_v4 }
  0x1c PF: > { %p773_p10 = scmp.ge.s32.totalorder %s948_s29, 1  ;;  %p289_p11 = scmp.lt.s32.totalorder %s948_s29, 3 }
  0x1e   : > { %p290_p12 = pnand %p773_p10, %p289_p11 }
  0x1f   : > { %s1051_s21 = sand.u32 (!%p290_p12), 1, %s940_s27  }
  0x20   : > { %293 = sbr.rel (%p290_p12) target bundleno = 435 (0x1b3), region = 82  ;;  %s774_s24 = sshll.u32 (!%p290_p12), %s1051_s21, 5 }
  0x21   : > { %s298_s9 = scalar_lea.vmem (!%p290_p12), [#allocation3], %s774_s24  ;;  %s775_s30 = sshll.u32 (!%p290_p12), %s1051_s21, 1 }
  0x22   : > { %s326_s16 = scalar_lea.vmem (!%p290_p12), [#allocation4], %s775_s30  ;;  %s906_s24 = scalar_lea.hbm (!%p290_p12), %s1170_s7, 4 }
  0x23   : > { %s699_s17 = sshll.u32 (!%p290_p12), %s326_s16, 4  ;;  %s700_s17 = int_to_ptr.vmem [resolvable:$true] %s699_s17 }
  0x25   : > { %v348_v5 = vld [vmem:[%s1165_s2 + $0x30] sm:$0xff]  ;;  %v950_v6 = vmov 0   ;;  %v346_v7 = vld [vmem:[%s1165_s2 + $0x20] sm:$0xff]  ;;  %v836_v9 = vld [vmem:[%s298_s9 + $0x14] sm:$0xf0]  ;;  %vm430_vm0 = vcmask 261120  }
  0x26   : > { %883 = vset.pattern.permute.xlu0 %v950_v6  ;;  %884 = vset.pattern.permute.xlu1 %v950_v6  ;;  %v802_v8 = vld [vmem:[%s298_s9 + $0x10] sm:$0xf]  ;;  %v835_v10 = vld [vmem:[%s298_s9 + $0x14] sm:$0xf]  ;;  %v804_v12 = vld [vmem:[%s298_s9 + $0x18] sm:$0xf0] }
  0x27   : > { %382 = vperm.xlu0 %883, %v348_v5   ;;  %372 = vperm.xlu1 %884, %v346_v7   ;;  %v803_v11 = vor.u32 %v836_v9, %v802_v8  ;;  %v794_v13 = vld [vmem:[%s298_s9] sm:$0xf]  ;;  %v834_v14 = vld [vmem:[%s298_s9 + $0x4] sm:$0xf0]  ;;  %v807_v15 = vor.u32 %v835_v10, %v804_v12  ;;  %v833_v16 = vld [vmem:[%s298_s9 + $0x4] sm:$0xf] }
  0x28   : > { %885 = vset.pattern.permute.xlu2 %v950_v6  ;;  %v796_v17 = vld [vmem:[%s298_s9 + $0x8] sm:$0xf0]  ;;  %v795_v18 = vor.u32 %v834_v14, %v794_v13  ;;  %v349_v20 = vld [vmem:[%s1165_s2 + $0x38] sm:$0xff]  ;;  %v837_v22 = vld [vmem:[%s1164_s1] sm:$0xff]  ;;  %vm563_vm1 = vcmask 523264   ;;  %s829_s9 = sshll.u32 %s766_s6, 1 }
  0x29   : > { %449 = vmatpush.bf16.msra.mxu0 %v803_v11  ;;  %478 = vmatpush.bf16.msra.mxu1 %v807_v15  ;;  %v799_v19 = vor.u32 %v833_v16, %v796_v17  ;;  %v347_v21 = vld [vmem:[%s1165_s2 + $0x28] sm:$0xff]  ;;  %v342_v23 = vld [vmem:[%s1165_s2] sm:$0xff]  ;;  %v523_v26 = vld [vmem:[%s1167_s4 + $0x10] sm:$0xff]  ;;  %s697_s15 = scalar_lea.hbm %s1170_s7, %s829_s9  ;;  %vm678_vm2 = vcmask 1040384   ;;  %s687_s6 = scalar_lea.sflag [#allocation5], %s1051_s21 }
  0x2a   : > { %v343_v24 = vld [vmem:[%s1165_s2 + $0x8] sm:$0xff]  ;;  %v344_v28 = vld [vmem:[%s1165_s2 + $0x10] sm:$0xff]  ;;  %v616_v29 = vld [vmem:[%s1168_s5] sm:$0xff]  ;;  %s701_s18 = sshll.u32 %s697_s15, 4  ;;  %s702_s18 = int_to_ptr.hbm [resolvable:$true] %s701_s18 }
  0x2b   : > { %v522_v25 = vld [vmem:[%s1167_s4 + $0x8] sm:$0xff]  ;;  %362 = vperm.xlu2 %885, %v344_v28   ;;  %v345_v31 = vld [vmem:[%s1165_s2 + $0x18] sm:$0xff]  ;;  %v620_v33 = vld [vmem:[#allocation2] sm:$0x1]  ;;  %s900_s19 = sshra.s32 %s702_s18, 4  ;;  %s901_s19 = int_to_ptr.hbm [resolvable:$true] %s900_s19 }
  0x2c   : > { %v838_v27 = vld [vmem:[%s1164_s1 + $0x8] sm:$0xff]  ;;  %v619_v32 = vld [vmem:[%s1168_s5 + $0x18] sm:$0xff]  ;;  %v839_v34 = vld [vmem:[%s1164_s1 + $0x10] sm:$0xff]  ;;  %s902_s20 = scalar_lea.hbm %s901_s19, 2  ;;  %p907_p2 = scmp.lt.s32.totalorder %s901_s19, %s1170_s7 }
  0x2d   : > { %450 = vmatpush.bf16.msra.mxu0 %v795_v18  ;;  %479 = vmatpush.bf16.msra.mxu1 %v799_v19  ;;  %v617_v30 = vld [vmem:[%s1168_s5 + $0x8] sm:$0xff]  ;;  %v521_v35 = vld [vmem:[%s1167_s4] sm:$0xff]  ;;  %v524_v36 = vld [vmem:[%s1167_s4 + $0x18] sm:$0xff]  ;;  %p903_p13 = scmp.ne.s32.totalorder %s901_s19, %s902_s20  ;;  %p908_p3 = scmp.lt.s32.totalorder %s906_s24, %s902_s20 }
  0x2e   : > { %v840_v37 = vld [vmem:[%s1164_s1 + $0x18] sm:$0xff]  ;;  %v618_v38 = vld [vmem:[%s1168_s5 + $0x10] sm:$0xff] }
  0x2f   : > { %387 = vperm.xlu0 %883, %v349_v20   ;;  %377 = vperm.xlu1 %884, %v347_v21   ;;  %p904_p0 = pnand %p903_p13, %p1032_p6  ;;  %p909_p4 = por %p908_p3, %p907_p2 }
  0x30   : > { %808 = vmatmul.msk.bf16.vlgmr.msra.gmra.mxu0 %vm430_vm0, %v837_v22  ;;  %812 = vmatmul.msk.bf16.vlgmr.msra.gmra.mxu1 %vm430_vm0, %v837_v22 }
  0x31   : > { %p905_p1 = pneg %p904_p0 }
  0x33   : > { %367 = vperm.xlu2 %885, %v345_v31   ;;  %p910_p5 = pnand %p909_p4, %p905_p1 }
  0x37   : > { %352 = vperm.xlu0 %883, %v342_v23   ;;  %357 = vperm.xlu1 %884, %v343_v24  }
  0x3b   : > { %535 = vperm.xlu2 %885, %v521_v35  }
  0x3f   : > { %540 = vperm.xlu0 %883, %v522_v25   ;;  %545 = vperm.xlu1 %884, %v523_v26  }
  0x40   : > { %809 = vmatmul.msk.bf16.gmra.mxu0 %vm430_vm0, %v838_v27  ;;  %813 = vmatmul.msk.bf16.gmra.mxu1 %vm430_vm0, %v838_v27 }
  0x43   : > { %550 = vperm.xlu2 %885, %v524_v36  }
  0x47   : > { %623 = vperm.xlu0 %883, %v616_v29   ;;  %628 = vperm.xlu1 %884, %v617_v30  }
  0x4b   : > { %633 = vperm.xlu2 %885, %v618_v38  }
  0x4f   : > { %638 = vperm.xlu0 %883, %v619_v32   ;;  %669 = vperm.xlu1 %884, %v620_v33  }
  0x50   : > { %810 = vmatmul.msk.bf16.gmra.mxu0 %vm430_vm0, %v839_v34  ;;  %814 = vmatmul.msk.bf16.gmra.mxu1 %vm430_vm0, %v839_v34 }
  0x60   : > { %811 = vmatmul.msk.bf16.gmra.mxu0 %vm430_vm0, %v840_v37  ;;  %815 = vmatmul.msk.bf16.gmra.mxu1 %vm430_vm0, %v840_v37 }
  0x85   : > { %v363_v53 = vpop.permute.xlu2 %362 }
  0x8d   : > { %v368_v0 = vpop.permute.xlu2 %367 }
  0x99   : > { %v373_v51 = vpop.permute.xlu1 %372  ;;  %v383_v52 = vpop.permute.xlu0 %382 }
  0xa1   : > { %v378_v56 = vpop.permute.xlu1 %377  ;;  %v388_v57 = vpop.permute.xlu0 %387 }
  0xa9   : > { %v358_v12 = vpop.permute.xlu1 %357  ;;  %v353_v20 = vpop.permute.xlu0 %352 }
  0xad   : > { %v452_v39 = vpop.f32.mrf.mxu0  ;;  %v481_v40 = vpop.f32.mrf.mxu1 }
  0xae   : > { %v453_v27 = vadd.f32 %v452_v39, %v353_v20  ;;  %v482_v29 = vadd.f32 %v481_v40, %v353_v20  ;;  %v842_v39 = vld [vmem:[%s1166_s3 + $0x8] sm:$0xff] }
  0xb0   : > { %v501_v35 = vmax.f32 %v453_v27, 0.0  ;;  %v502_v36 = vmax.f32 %v482_v29, 0.0 }
  0xb5   : > { %v454_v41 = vpop.f32.mrf.mxu0  ;;  %v483_v42 = vpop.f32.mrf.mxu1 }
  0xb6   : > { %v455_v21 = vadd.f32 %v454_v41, %v358_v12  ;;  %v484_v24 = vadd.f32 %v483_v42, %v358_v12  ;;  %v841_v41 = vld [vmem:[%s1166_s3] sm:$0xff] }
  0xb8   : > { %v503_v31 = vmax.f32 %v455_v21, 0.0  ;;  %v504_v33 = vmax.f32 %v484_v24, 0.0 }
  0xba   : > { %v525_v37 = vpack.c.bf16 %v503_v31, %v501_v35  ;;  %v526_v38 = vpack.c.bf16 %v504_v33, %v502_v36 }
  0xbd   : > { %v457_v43 = vpop.f32.mrf.mxu0  ;;  %v486_v44 = vpop.f32.mrf.mxu1 }
  0xbe   : > { %v458_v16 = vadd.f32 %v457_v43, %v363_v53  ;;  %v487_v18 = vadd.f32 %v486_v44, %v363_v53  ;;  %v536_v43 = vpop.permute.xlu2 %535  ;;  %v541_v44 = vpop.permute.xlu0 %540 }
  0xc0   : > { %v505_v28 = vmax.f32 %v458_v16, 0.0  ;;  %v506_v30 = vmax.f32 %v487_v18, 0.0 }
  0xc5   : > { %v459_v45 = vpop.f32.mrf.mxu0  ;;  %v488_v46 = vpop.f32.mrf.mxu1 }
  0xc6   : > { %v460_v9 = vadd.f32 %v459_v45, %v368_v0  ;;  %v489_v13 = vadd.f32 %v488_v46, %v368_v0 }
  0xc8   : > { %v507_v22 = vmax.f32 %v460_v9, 0.0  ;;  %v508_v25 = vmax.f32 %v489_v13, 0.0 }
  0xca   : > { %v527_v32 = vpack.c.bf16 %v507_v22, %v505_v28  ;;  %v528_v34 = vpack.c.bf16 %v508_v25, %v506_v30 }
  0xcd   : > { %v462_v47 = vpop.f32.mrf.mxu0  ;;  %v491_v48 = vpop.f32.mrf.mxu1 }
  0xce   : > { %v463_v3 = vadd.f32 %v462_v47, %v373_v51  ;;  %v492_v6 = vadd.f32 %v491_v48, %v373_v51  ;;  %v546_v47 = vpop.permute.xlu1 %545  ;;  %v551_v48 = vpop.permute.xlu2 %550 }
  0xd0   : > { %v509_v17 = vmax.f32 %v463_v3, 0.0  ;;  %v510_v19 = vmax.f32 %v492_v6, 0.0 }
  0xd5   : > { %v464_v49 = vpop.f32.mrf.mxu0  ;;  %v493_v50 = vpop.f32.mrf.mxu1 }
  0xd6   : > { %v465_v61 = vadd.f32 %v464_v49, %v378_v56  ;;  %v494_v1 = vadd.f32 %v493_v50, %v378_v56 }
  0xd8   : > { %v511_v10 = vmax.f32 %v465_v61, 0.0  ;;  %v512_v14 = vmax.f32 %v494_v1, 0.0 }
  0xda   : > { %v529_v23 = vpack.c.bf16 %v511_v10, %v509_v17  ;;  %v530_v26 = vpack.c.bf16 %v512_v14, %v510_v19 }
  0xdd   : > { %v467_v54 = vpop.f32.mrf.mxu0  ;;  %v496_v55 = vpop.f32.mrf.mxu1 }
  0xde   : > { %v468_v58 = vadd.f32 %v467_v54, %v383_v52  ;;  %v497_v59 = vadd.f32 %v496_v55, %v383_v52  ;;  %v624_v55 = vpop.permute.xlu0 %623 }
  0xe0   : > { %v513_v4 = vmax.f32 %v468_v58, 0.0  ;;  %v514_v7 = vmax.f32 %v497_v59, 0.0 }
  0xe5   : > { %v469_v60 = vpop.f32.mrf.mxu0  ;;  %v498_v63 = vpop.f32.mrf.mxu1 }
  0xe6   : > { %v470_v62 = vadd.f32 %v469_v60, %v388_v57  ;;  %v499_v2 = vadd.f32 %v498_v63, %v388_v57  ;;  %v639_v14 = vpop.permute.xlu0 %638 }
  0xe8   : > { %v515_v5 = vmax.f32 %v470_v62, 0.0  ;;  %v516_v8 = vmax.f32 %v499_v2, 0.0  ;;  %v629_v62 = vpop.permute.xlu1 %628  ;;  %v634_v2 = vpop.permute.xlu2 %633 }
  0xea   : > { %v531_v11 = vpack.c.bf16 %v515_v5, %v513_v4  ;;  %v532_v15 = vpack.c.bf16 %v516_v8, %v514_v7 }
  0xec   : > { %574 = vmatpush.bf16.msra.mxu2 %v531_v11  ;;  %593 = vmatpush.bf16.msra.mxu3 %v532_v15 }
  0xf0   : > { %575 = vmatpush.bf16.msra.mxu2 %v529_v23  ;;  %594 = vmatpush.bf16.msra.mxu3 %v530_v26  ;;  %v670_v31 = vpop.permute.xlu1 %669 }
  0xf4   : > { %576 = vmatpush.bf16.msra.mxu2 %v527_v32  ;;  %595 = vmatpush.bf16.msra.mxu3 %v528_v34  ;;  %v672_v34 = vperm.slane %v670_v31, 0 }
  0xf8   : > { %577 = vmatpush.bf16.msra.mxu2 %v525_v37  ;;  %596 = vmatpush.bf16.msra.mxu3 %v526_v38  ;;  %v681_v37 = vlaneseq }
  0xfa   : > { %vm683_vm3 = vcmp.lt.s32.totalorder %v681_v37, 256 }
  0xfb   : > { %824 = vmatmul.msk.bf16.vlgmr.msra.gmra.mxu2 %vm563_vm1, %v841_v41  ;;  %826 = vmatmul.msk.bf16.vlgmr.msra.gmra.mxu3 %vm563_vm1, %v841_v41 }
 0x10b   : > { %825 = vmatmul.msk.bf16.gmra.mxu2 %vm563_vm1, %v842_v39  ;;  %827 = vmatmul.msk.bf16.gmra.mxu3 %vm563_vm1, %v842_v39 }
 0x17e   : > { %v579_v40 = vpop.f32.mrf.mxu2  ;;  %v598_v42 = vpop.f32.mrf.mxu3 }
 0x17f   : > { %v580_v52 = vadd.f32 %v579_v40, %v536_v43  ;;  %v599_v56 = vadd.f32 %v598_v42, %v536_v43 }
 0x181   : > { %v608_v60 = vmax.f32 %v580_v52, 0.0  ;;  %v609_v63 = vmax.f32 %v599_v56, 0.0 }
 0x183   : > { %v641_v5 = vmul.f32 %v624_v55, %v608_v60  ;;  %v642_v9 = vmul.f32 %v624_v55, %v609_v63 }
 0x186   : > { %v581_v45 = vpop.f32.mrf.mxu2  ;;  %v600_v46 = vpop.f32.mrf.mxu3 }
 0x187   : > { %v582_v49 = vadd.f32 %v581_v45, %v541_v44  ;;  %v601_v50 = vadd.f32 %v600_v46, %v541_v44 }
 0x189   : > { %v610_v58 = vmax.f32 %v582_v49, 0.0  ;;  %v611_v59 = vmax.f32 %v601_v50, 0.0 }
 0x18b   : > { %v643_v1 = vmul.f32 %v629_v62, %v610_v58  ;;  %v644_v3 = vmul.f32 %v629_v62, %v611_v59 }
 0x18d   : > { %v649_v12 = vadd.f32 %v643_v1, %v641_v5  ;;  %v658_v15 = vadd.f32 %v644_v3, %v642_v9 }
 0x18e   : > { %v584_v51 = vpop.f32.mrf.mxu2  ;;  %v603_v54 = vpop.f32.mrf.mxu3 }
 0x18f   : > { %v585_v53 = vadd.f32 %v584_v51, %v546_v47  ;;  %v604_v57 = vadd.f32 %v603_v54, %v546_v47 }
 0x191   : > { %v612_v61 = vmax.f32 %v585_v53, 0.0  ;;  %v613_v0 = vmax.f32 %v604_v57, 0.0 }
 0x193   : > { %v645_v6 = vmul.f32 %v634_v2, %v612_v61  ;;  %v646_v10 = vmul.f32 %v634_v2, %v613_v0 }
 0x195   : > { %v650_v17 = vadd.f32 %v649_v12, %v645_v6  ;;  %v659_v19 = vadd.f32 %v658_v15, %v646_v10 }
 0x196   : > { %v586_v4 = vpop.f32.mrf.mxu2  ;;  %v605_v8 = vpop.f32.mrf.mxu3 }
 0x197   : > { %v587_v7 = vadd.f32 %v586_v4, %v551_v48  ;;  %v606_v11 = vadd.f32 %v605_v8, %v551_v48 }
 0x199   : > { %v614_v13 = vmax.f32 %v587_v7, 0.0  ;;  %v615_v16 = vmax.f32 %v606_v11, 0.0 }
 0x19b   : > { %v647_v18 = vmul.f32 %v639_v14, %v614_v13  ;;  %v648_v20 = vmul.f32 %v639_v14, %v615_v16 }
 0x19d   : > { %v651_v21 = vadd.f32 %v650_v17, %v647_v18  ;;  %v660_v22 = vadd.f32 %v659_v19, %v648_v20 }
 0x19f   : > { %v652_v23 = vrot.slane %v651_v21, 4  ;;  %v661_v24 = vrot.slane %v660_v22, 4 }
 0x1a1   : > { %v653_v25 = vadd.f32 %v652_v23, %v651_v21  ;;  %v662_v26 = vadd.f32 %v661_v24, %v660_v22 }
 0x1a3   : > { %v654_v27 = vrot.slane %v653_v25, 2  ;;  %v663_v28 = vrot.slane %v662_v26, 2 }
 0x1a5   : > { %v655_v29 = vadd.f32 %v654_v27, %v653_v25  ;;  %v664_v30 = vadd.f32 %v663_v28, %v662_v26 }
 0x1a7   : > { %v656_v32 = vrot.slane %v655_v29, 1  ;;  %v665_v33 = vrot.slane %v664_v30, 1 }
 0x1a9   : > { %v657_v35 = vadd.f32 %v656_v32, %v655_v29  ;;  %v666_v36 = vadd.f32 %v665_v33, %v664_v30 }
 0x1ab   : > { %v674_v38 = vadd.f32 %v672_v34, %v666_v36  ;;  %v673_v41 = vadd.f32 %v672_v34, %v657_v35 }
 0x1ad   : > { %v677_v39 = vrot.slane %v674_v38, 7 }
 0x1af   : > { %v679_v40 = vsel %vm678_vm2, %v673_v41, %v677_v39 }
 0x1b0   : > { %685 = vst.msk [vmem:[%s326_s16] sm:$0x3] %vm683_vm3, %v679_v40 }
 0x1b1   : > { %913 = shalt.err (!%p910_p5)
}
 0x1b2   : > { %843 = dma.vmem_to_hbm [thread:$0]  (%p1032_p6), %s700_s17, 32, %s702_s18, %s687_s6  }
 0x1b3 PF: > { %s713_s21 = sand.u32 1, %s936_s26   ;;  %p846_p7 = pnand %p769_p9, %p1036_p8 }
 0x1b4   : > { %s714_s9 = scalar_lea.sflag [#allocation5], %s713_s21 }
 0x1b5   : > { %p847_p10 = pneg %p846_p7 }
 0x1b7   : > { %931 = dma.done.wait (%p847_p10), %s714_s9, 32  }
 0x1b8   : > { %933 = vsyncadd (%p847_p10), %s714_s9, 4294967264  ;;  %p19_p11 = scmp.ge.s32.totalorder %s1017_s8, 4   ;;  %s1173_s26 = smov %s940_s27 }
 0x1b9   : > { %s1174_s27 = smov %s944_s28  ;;  %s1175_s28 = smov %s1030_s11 }
 0x1ba   : > { %s1176_s29 = smov %s1017_s8  ;;  %21 = sbr.rel (!%p19_p11) target bundleno = 6 (0x6), region = 126 }
 0x1bf   :  { %720 = vsyncpa [#allocation5], 1 }
 0x1c0   :  { %722 = vsyncpa [#allocation5 + $0x1], 1 }

</bundles_post_ra>
